<compile_context>
chip_gen: v5e
topology: v5e:2x2
jax: 0.10.0
libtpu: 0.0.40
codegen_flags: <defaults>
</compile_context>

<pallas_src>
import functools

import jax
import jax.numpy as jnp
from jax.experimental import pallas as pl
from jax.experimental.pallas import tpu as pltpu


def _round_up(n, m):
    return ((n + m - 1) // m) * m


def rnn_model_kernel(layer_dim, has_static, mxu_dtype, *refs):
    """One grid step == one RNN timestep.  Hidden state persists in VMEM scratch."""
    refs = list(refs)
    xw_ref = refs.pop(0)            # (1, B, Hp)  precomputed layer-0 input proj (+bias)
    whh0_ref = refs.pop(0)          # (Hp, Hp)    layer-0 recurrent weight (transposed)

    layer_w = []
    for _ in range(layer_dim - 1):
        W = refs.pop(0)             # (2*Hp, Hp)  [W_ih^T ; W_hh^T] stacked, padded
        b = refs.pop(0)             # (1, Hp)     b_ih + b_hh, padded
        layer_w.append((W, b))

    if has_static:
        xs_ref = refs.pop(0)        # (B, Dstat)
        wst_ref = refs.pop(0)       # (Dstat, Hsp)
        bst_ref = refs.pop(0)       # (1, Hsp)
        wfcs_ref = refs.pop(0)      # (Hsp, Doutp)

    wfch_ref = refs.pop(0)          # (Hp, Doutp)
    bfc_ref = refs.pop(0)           # (1, Doutp)

    out_ref = refs.pop(0)           # (B, Doutp)
    h_ref = refs.pop(0)             # scratch (L, B, Hp), persists across grid steps

    t = pl.program_id(0)

    @pl.when(t == 0)
    def _():
        h_ref[...] = jnp.zeros_like(h_ref)

    # ---- layer 0: input projection (incl. both biases) was hoisted out of the
    #      recurrence; only the serial h-path matmul remains here.
    z0 = xw_ref[0] + jnp.dot(h_ref[0].astype(mxu_dtype), whh0_ref[...],
                             preferred_element_type=jnp.float32)
    cur = jnp.tanh(z0)
    h_ref[0] = cur

    # ---- layers >= 1: fused [input ; recurrent] matmul per layer.
    for l, (W, b) in enumerate(layer_w, start=1):
        inp = jnp.concatenate([cur, h_ref[l]], axis=-1)          # (B, 2*Hp)
        z = jnp.dot(inp.astype(mxu_dtype), W[...],
                    preferred_element_type=jnp.float32) + b[...]
        cur = jnp.tanh(z)
        h_ref[l] = cur

    # ---- heads: only on the last timestep (out[:, -1, :] semantics).
    @pl.when(t == pl.num_programs(0) - 1)
    def _():
        h_last = h_ref[layer_dim - 1]                            # (B, Hp)
        out = jnp.dot(h_last.astype(mxu_dtype), wfch_ref[...],
                      preferred_element_type=jnp.float32) + bfc_ref[...]
        if has_static:
            h1 = jnp.dot(xs_ref[...].astype(mxu_dtype), wst_ref[...],
                         preferred_element_type=jnp.float32) + bst_ref[...]
            out = out + jnp.dot(h1.astype(mxu_dtype), wfcs_ref[...],
                                preferred_element_type=jnp.float32)
        out_ref[...] = out.astype(out_ref.dtype)


def rnn_model_forward(x, params, x_static=None, mxu_dtype=jnp.float32):
    """Pallas-backed equivalent of RNNModel.forward(x, x_static)."""
    B, T, Din = x.shape
    layer_params = params["rnn"]
    L = len(layer_params)
    H = layer_params[0]["w_hh"].shape[0]
    Hp = _round_up(H, 128)
    has_static = x_static is not None

    Wfc, bfc = params["fc_w"], params["fc_b"]
    Dout = Wfc.shape[0]
    Doutp = _round_up(Dout, 128)

    # ---- layer 0 input projection for all timesteps as one big matmul, folded bias,
    #      written time-major so the kernel streams (1, B, Hp) tiles per grid step.
    p0 = layer_params[0]
    w_ih0 = jnp.zeros((Din, Hp), jnp.float32).at[:, :H].set(p0["w_ih"].T)
    b0 = jnp.zeros((Hp,), jnp.float32).at[:H].set(p0["b_ih"] + p0["b_hh"])
    xw0 = jnp.einsum("btd,dh->tbh", x.astype(jnp.float32), w_ih0) + b0      # (T, B, Hp)

    w_hh0 = (jnp.zeros((Hp, Hp), jnp.float32)
             .at[:H, :H].set(p0["w_hh"].T).astype(mxu_dtype))

    args = [xw0, w_hh0]
    in_specs = [
        pl.BlockSpec((1, B, Hp), lambda t: (t, 0, 0)),     # streamed per timestep
        pl.BlockSpec((Hp, Hp), lambda t: (0, 0)),          # resident across grid
    ]

    # ---- layers >= 1: stack input/recurrent weights, fold biases, pad to 128 lanes.
    for p in layer_params[1:]:
        W = jnp.zeros((2 * Hp, Hp), jnp.float32)
        W = W.at[:H, :H].set(p["w_ih"].T)                  # rows [0, Hp): prev-layer hidden
        W = W.at[Hp:Hp + H, :H].set(p["w_hh"].T)           # rows [Hp, 2Hp): recurrent
        b = jnp.zeros((1, Hp), jnp.float32).at[0, :H].set(p["b_ih"] + p["b_hh"])
        args += [W.astype(mxu_dtype), b]
        in_specs += [pl.BlockSpec((2 * Hp, Hp), lambda t: (0, 0)),
                     pl.BlockSpec((1, Hp), lambda t: (0, 0))]

    if has_static:
        Dstat = x_static.shape[1]
        Hs = params["static_w"].shape[0]
        Hsp = _round_up(Hs, 128)
        wst = (jnp.zeros((Dstat, Hsp), jnp.float32)
               .at[:, :Hs].set(params["static_w"].T).astype(mxu_dtype))
        bst = jnp.zeros((1, Hsp), jnp.float32).at[0, :Hs].set(params["static_b"])
        # split fc:  [h_last, h1] @ Wfc.T = h_last @ Wfc[:, :H].T + h1 @ Wfc[:, H:].T
        wfcs = (jnp.zeros((Hsp, Doutp), jnp.float32)
                .at[:Hs, :Dout].set(Wfc[:, H:].T).astype(mxu_dtype))
        wfch_src = Wfc[:, :H]
        args += [x_static.astype(jnp.float32), wst, bst, wfcs]
        in_specs += [pl.BlockSpec((B, Dstat), lambda t: (0, 0)),
                     pl.BlockSpec((Dstat, Hsp), lambda t: (0, 0)),
                     pl.BlockSpec((1, Hsp), lambda t: (0, 0)),
                     pl.BlockSpec((Hsp, Doutp), lambda t: (0, 0))]
    else:
        wfch_src = Wfc                                      # expects shape (Dout, H)

    wfch = (jnp.zeros((Hp, Doutp), jnp.float32)
            .at[:H, :Dout].set(wfch_src.T).astype(mxu_dtype))
    bfc_p = jnp.zeros((1, Doutp), jnp.float32).at[0, :Dout].set(bfc)
    args += [wfch, bfc_p]
    in_specs += [pl.BlockSpec((Hp, Doutp), lambda t: (0, 0)),
                 pl.BlockSpec((1, Doutp), lambda t: (0, 0))]

    kernel = functools.partial(rnn_model_kernel, L, has_static, mxu_dtype)

    out_p = pl.pallas_call(
        kernel,
        out_shape=jax.ShapeDtypeStruct((B, Doutp), jnp.float32),
        grid_spec=pltpu.PrefetchScalarGridSpec(
            num_scalar_prefetch=0,
            grid=(T,),
            in_specs=in_specs,
            out_specs=pl.BlockSpec((B, Doutp), lambda t: (0, 0)),
            scratch_shapes=[pltpu.VMEM((L, B, Hp), jnp.float32)],
        ),
        compiler_params=pltpu.CompilerParams(
            dimension_semantics=("arbitrary",),   # time steps are sequential (h carry)
        ),
    )(*args)

    return out_p[:, :Dout]      # strip lane padding


def reference_forward(x, params, x_static=None):
    """Pure-JAX reference matching PyTorch RNNModel.forward semantics."""
    B, T, _ = x.shape
    L = len(params["rnn"])
    H = params["rnn"][0]["w_hh"].shape[0]
    h = jnp.zeros((L, B, H), jnp.float32)
    for t in range(T):
        cur = x[:, t, :]
        new_h = []
        for l, p in enumerate(params["rnn"]):
            z = cur @ p["w_ih"].T + p["b_ih"] + h[l] @ p["w_hh"].T + p["b_hh"]
            cur = jnp.tanh(z)
            new_h.append(cur)
        h = jnp.stack(new_h)
    out = h[-1]                                            # out[:, -1, :]
    if x_static is not None:
        h1 = x_static @ params["static_w"].T + params["static_b"]
        out = jnp.concatenate([out, h1], axis=-1)
    return out @ params["fc_w"].T + params["fc_b"]


def init_params(key, input_dim, static_input_dim, hidden_dim,
                static_hidden_dim, layer_dim, output_dim):
    keys = jax.random.split(key, 4 * layer_dim + 4)
    ki = iter(keys)
    rnn = []
    for l in range(layer_dim):
        din_l = input_dim if l == 0 else hidden_dim
        rnn.append(dict(
            w_ih=0.1 * jax.random.normal(next(ki), (hidden_dim, din_l), jnp.float32),
            w_hh=0.1 * jax.random.normal(next(ki), (hidden_dim, hidden_dim), jnp.float32),
            b_ih=0.1 * jax.random.normal(next(ki), (hidden_dim,), jnp.float32),
            b_hh=0.1 * jax.random.normal(next(ki), (hidden_dim,), jnp.float32),
        ))
    static_w = 0.1 * jax.random.normal(next(ki), (static_hidden_dim, static_input_dim), jnp.float32)
    static_b = 0.1 * jax.random.normal(next(ki), (static_hidden_dim,), jnp.float32)
    fc_w = 0.1 * jax.random.normal(next(ki), (output_dim, hidden_dim + static_hidden_dim), jnp.float32)
    fc_b = 0.1 * jax.random.normal(next(ki), (output_dim,), jnp.float32)
    return dict(rnn=rnn, static_w=static_w, static_b=static_b, fc_w=fc_w, fc_b=fc_b)


if __name__ == "__main__":
    # small shapes consistent with the module's forward
    B, T = 2, 8
    input_dim, static_input_dim = 4, 6
    hidden_dim, static_hidden_dim = 32, 16
    layer_dim, output_dim = 2, 3

    key = jax.random.PRNGKey(0)
    kx, ks, kp = jax.random.split(key, 3)
    x = jax.random.normal(kx, (B, T, input_dim), jnp.float32)
    x_static = jax.random.normal(ks, (B, static_input_dim), jnp.float32)
    params = init_params(kp, input_dim, static_input_dim, hidden_dim,
                         static_hidden_dim, layer_dim, output_dim)

    # TODO(synk): on v6e/v7x pass mxu_dtype=jnp.bfloat16 for full-rate MXU (loosen tolerance).
    out = rnn_model_forward(x, params, x_static)
    out = jax.block_until_ready(out)

    ref = reference_forward(x, params, x_static)
    assert out.shape == (B, output_dim)
    assert jnp.allclose(out, ref, atol=1e-5, rtol=1e-5), (out, ref)

    print("KERNEL_OK")
</pallas_src>

<mosaic_0001>
module attributes {stable_mosaic.version = 11 : i64} {
  func.func @rnn_model_kernel(%arg0: i32, %arg1: memref<1x2x128xf32, #tpu.memory_space<vmem>>, %arg2: memref<128x128xf32, #tpu.memory_space<vmem>>, %arg3: memref<256x128xf32, #tpu.memory_space<vmem>>, %arg4: memref<1x128xf32, #tpu.memory_space<vmem>>, %arg5: memref<2x6xf32, #tpu.memory_space<vmem>>, %arg6: memref<6x128xf32, #tpu.memory_space<vmem>>, %arg7: memref<1x128xf32, #tpu.memory_space<vmem>>, %arg8: memref<128x128xf32, #tpu.memory_space<vmem>>, %arg9: memref<128x128xf32, #tpu.memory_space<vmem>>, %arg10: memref<1x128xf32, #tpu.memory_space<vmem>>, %arg11: memref<2x128xf32, #tpu.memory_space<vmem>>, %arg12: memref<2x2x128xf32, #tpu.memory_space<vmem>>) attributes {dimension_semantics = [#tpu.dimension_semantics<arbitrary>], iteration_bounds = array<i64: 8>, scalar_prefetch = 0 : i64, scratch_operands = 1 : i64, tpu.core_type = #tpu.core_type<tc>, window_params = [{transform_indices = @transform_0, window_bounds = array<i64: 1, 2, 128>}, {pipeline_mode = #tpu.pipeline_mode<synchronous>, transform_indices = @transform_1, window_bounds = array<i64: 128, 128>}, {pipeline_mode = #tpu.pipeline_mode<synchronous>, transform_indices = @transform_2, window_bounds = array<i64: 256, 128>}, {pipeline_mode = #tpu.pipeline_mode<synchronous>, transform_indices = @transform_3, window_bounds = array<i64: 1, 128>}, {pipeline_mode = #tpu.pipeline_mode<synchronous>, transform_indices = @transform_4, window_bounds = array<i64: 2, 6>}, {pipeline_mode = #tpu.pipeline_mode<synchronous>, transform_indices = @transform_5, window_bounds = array<i64: 6, 128>}, {pipeline_mode = #tpu.pipeline_mode<synchronous>, transform_indices = @transform_6, window_bounds = array<i64: 1, 128>}, {pipeline_mode = #tpu.pipeline_mode<synchronous>, transform_indices = @transform_7, window_bounds = array<i64: 128, 128>}, {pipeline_mode = #tpu.pipeline_mode<synchronous>, transform_indices = @transform_8, window_bounds = array<i64: 128, 128>}, {pipeline_mode = #tpu.pipeline_mode<synchronous>, transform_indices = @transform_9, window_bounds = array<i64: 1, 128>}, {pipeline_mode = #tpu.pipeline_mode<synchronous>, transform_indices = @transform_10, window_bounds = array<i64: 2, 128>}]} {
    %c0_i32 = arith.constant 0 : i32
    %0 = arith.cmpi eq, %arg0, %c0_i32 : i32
    %1 = arith.extui %0 : i1 to i32
    %c0_i32_0 = arith.constant 0 : i32
    %2 = arith.cmpi ne, %1, %c0_i32_0 : i32
    scf.if %2 {
      %cst_22 = arith.constant 0.000000e+00 : f32
      %29 = vector.broadcast %cst_22 : f32 to vector<2x2x128xf32>
      %c0_23 = arith.constant 0 : index
      %c0_24 = arith.constant 0 : index
      %c0_25 = arith.constant 0 : index
      %30 = vector.load %arg12[%c0_23, %c0_24, %c0_25] : memref<2x2x128xf32, #tpu.memory_space<vmem>>, vector<2x2x128xf32>
      tpu.vector_store %arg12[%c0_23, %c0_24, %c0_25], %29 {strides = array<i32>} : memref<2x2x128xf32, #tpu.memory_space<vmem>>, vector<2x2x128xf32>,
    } else {
    }
    %c0 = arith.constant 0 : index
    %c0_1 = arith.constant 0 : index
    %c0_2 = arith.constant 0 : index
    %3 = vector.load %arg1[%c0, %c0_1, %c0_2] : memref<1x2x128xf32, #tpu.memory_space<vmem>>, vector<1x2x128xf32>
    %4 = vector.shape_cast %3 : vector<1x2x128xf32> to vector<2x128xf32>
    %c0_3 = arith.constant 0 : index
    %c0_4 = arith.constant 0 : index
    %c0_5 = arith.constant 0 : index
    %5 = vector.load %arg12[%c0_3, %c0_4, %c0_5] : memref<2x2x128xf32, #tpu.memory_space<vmem>>, vector<1x2x128xf32>
    %6 = vector.shape_cast %5 : vector<1x2x128xf32> to vector<2x128xf32>
    %c0_6 = arith.constant 0 : index
    %c0_7 = arith.constant 0 : index
    %7 = vector.load %arg2[%c0_6, %c0_7] : memref<128x128xf32, #tpu.memory_space<vmem>>, vector<128x128xf32>
    %cst = arith.constant dense<0.000000e+00> : vector<2x128xf32>
    %8 = tpu.matmul %6, %7, %cst {dimension_numbers = #tpu.dot_dimension_numbers<[1], [0], [0], [1], [0, 0, 1, 1], [], []>} : vector<2x128xf32>, vector<128x128xf32>, vector<2x128xf32> -> vector<2x128xf32>
    %9 = arith.addf %4, %8 : vector<2x128xf32>
    %10 = math.tanh %9 : vector<2x128xf32>
    %c0_8 = arith.constant 0 : index
    %c0_9 = arith.constant 0 : index
    %c0_10 = arith.constant 0 : index
    %11 = vector.load %arg12[%c0_8, %c0_9, %c0_10] : memref<2x2x128xf32, #tpu.memory_space<vmem>>, vector<1x2x128xf32>
    %12 = vector.shape_cast %11 : vector<1x2x128xf32> to vector<2x128xf32>
    %13 = vector.shape_cast %10 : vector<2x128xf32> to vector<1x2x128xf32>
    tpu.vector_store %arg12[%c0_8, %c0_9, %c0_10], %13 {strides = array<i32>} : memref<2x2x128xf32, #tpu.memory_space<vmem>>, vector<1x2x128xf32>,
    %c1 = arith.constant 1 : index
    %c0_11 = arith.constant 0 : index
    %c0_12 = arith.constant 0 : index
    %14 = vector.load %arg12[%c1, %c0_11, %c0_12] : memref<2x2x128xf32, #tpu.memory_space<vmem>>, vector<1x2x128xf32>
    %15 = vector.shape_cast %14 : vector<1x2x128xf32> to vector<2x128xf32>
    %16 = tpu.concatenate %10, %15 in 1 : vector<2x128xf32>, vector<2x128xf32> -> vector<2x256xf32>
    %c0_13 = arith.constant 0 : index
    %c0_14 = arith.constant 0 : index
    %17 = vector.load %arg3[%c0_13, %c0_14] : memref<256x128xf32, #tpu.memory_space<vmem>>, vector<256x128xf32>
    %cst_15 = arith.constant dense<0.000000e+00> : vector<2x128xf32>
    %18 = tpu.matmul %16, %17, %cst_15 {dimension_numbers = #tpu.dot_dimension_numbers<[1], [0], [0], [1], [0, 0, 1, 1], [], []>} : vector<2x256xf32>, vector<256x128xf32>, vector<2x128xf32> -> vector<2x128xf32>
    %c0_16 = arith.constant 0 : index
    %c0_17 = arith.constant 0 : index
    %19 = vector.load %arg4[%c0_16, %c0_17] : memref<1x128xf32, #tpu.memory_space<vmem>>, vector<1x128xf32>
    %20 = vector.broadcast %19 : vector<1x128xf32> to vector<2x128xf32>
    %21 = arith.addf %18, %20 : vector<2x128xf32>
    %22 = math.tanh %21 : vector<2x128xf32>
    %c1_18 = arith.constant 1 : index
    %c0_19 = arith.constant 0 : index
    %c0_20 = arith.constant 0 : index
    %23 = vector.load %arg12[%c1_18, %c0_19, %c0_20] : memref<2x2x128xf32, #tpu.memory_space<vmem>>, vector<1x2x128xf32>
    %24 = vector.shape_cast %23 : vector<1x2x128xf32> to vector<2x128xf32>
    %25 = vector.shape_cast %22 : vector<2x128xf32> to vector<1x2x128xf32>
    tpu.vector_store %arg12[%c1_18, %c0_19, %c0_20], %25 {strides = array<i32>} : memref<2x2x128xf32, #tpu.memory_space<vmem>>, vector<1x2x128xf32>,
    %c7_i32 = arith.constant 7 : i32
    %26 = arith.cmpi eq, %arg0, %c7_i32 : i32
    %27 = arith.extui %26 : i1 to i32
    %c0_i32_21 = arith.constant 0 : i32
    %28 = arith.cmpi ne, %27, %c0_i32_21 : i32
    scf.if %28 {
      %c1_22 = arith.constant 1 : index
      %c0_23 = arith.constant 0 : index
      %c0_24 = arith.constant 0 : index
      %29 = vector.load %arg12[%c1_22, %c0_23, %c0_24] : memref<2x2x128xf32, #tpu.memory_space<vmem>>, vector<1x2x128xf32>
      %30 = vector.shape_cast %29 : vector<1x2x128xf32> to vector<2x128xf32>
      %c0_25 = arith.constant 0 : index
      %c0_26 = arith.constant 0 : index
      %31 = vector.load %arg9[%c0_25, %c0_26] : memref<128x128xf32, #tpu.memory_space<vmem>>, vector<128x128xf32>
      %cst_27 = arith.constant dense<0.000000e+00> : vector<2x128xf32>
      %32 = tpu.matmul %30, %31, %cst_27 {dimension_numbers = #tpu.dot_dimension_numbers<[1], [0], [0], [1], [0, 0, 1, 1], [], []>} : vector<2x128xf32>, vector<128x128xf32>, vector<2x128xf32> -> vector<2x128xf32>
      %c0_28 = arith.constant 0 : index
      %c0_29 = arith.constant 0 : index
      %33 = vector.load %arg10[%c0_28, %c0_29] : memref<1x128xf32, #tpu.memory_space<vmem>>, vector<1x128xf32>
      %34 = vector.broadcast %33 : vector<1x128xf32> to vector<2x128xf32>
      %35 = arith.addf %32, %34 : vector<2x128xf32>
      %c0_30 = arith.constant 0 : index
      %c0_31 = arith.constant 0 : index
      %36 = vector.load %arg5[%c0_30, %c0_31] : memref<2x6xf32, #tpu.memory_space<vmem>>, vector<2x6xf32>
      %c0_32 = arith.constant 0 : index
      %c0_33 = arith.constant 0 : index
      %37 = vector.load %arg6[%c0_32, %c0_33] : memref<6x128xf32, #tpu.memory_space<vmem>>, vector<6x128xf32>
      %cst_34 = arith.constant dense<0.000000e+00> : vector<2x128xf32>
      %38 = tpu.matmul %36, %37, %cst_34 {dimension_numbers = #tpu.dot_dimension_numbers<[1], [0], [0], [1], [0, 0, 1, 1], [], []>} : vector<2x6xf32>, vector<6x128xf32>, vector<2x128xf32> -> vector<2x128xf32>
      %c0_35 = arith.constant 0 : index
      %c0_36 = arith.constant 0 : index
      %39 = vector.load %arg7[%c0_35, %c0_36] : memref<1x128xf32, #tpu.memory_space<vmem>>, vector<1x128xf32>
      %40 = vector.broadcast %39 : vector<1x128xf32> to vector<2x128xf32>
      %41 = arith.addf %38, %40 : vector<2x128xf32>
      %c0_37 = arith.constant 0 : index
      %c0_38 = arith.constant 0 : index
      %42 = vector.load %arg8[%c0_37, %c0_38] : memref<128x128xf32, #tpu.memory_space<vmem>>, vector<128x128xf32>
      %cst_39 = arith.constant dense<0.000000e+00> : vector<2x128xf32>
      %43 = tpu.matmul %41, %42, %cst_39 {dimension_numbers = #tpu.dot_dimension_numbers<[1], [0], [0], [1], [0, 0, 1, 1], [], []>} : vector<2x128xf32>, vector<128x128xf32>, vector<2x128xf32> -> vector<2x128xf32>
      %44 = arith.addf %35, %43 : vector<2x128xf32>
      %c0_40 = arith.constant 0 : index
      %c0_41 = arith.constant 0 : index
      %45 = vector.load %arg11[%c0_40, %c0_41] : memref<2x128xf32, #tpu.memory_space<vmem>>, vector<2x128xf32>
      tpu.vector_store %arg11[%c0_40, %c0_41], %44 {strides = array<i32>} : memref<2x128xf32, #tpu.memory_space<vmem>>, vector<2x128xf32>,
    } else {
    }
    return
  }
  func.func @transform_0(%arg0: i32) -> (i32, i32, i32) {
    %c0_i32 = arith.constant 0 : i32
    %c0_i32_0 = arith.constant 0 : i32
    %c0_i32_1 = arith.constant 0 : i32
    return %arg0, %c0_i32, %c0_i32_0 : i32, i32, i32
  }
  func.func @transform_1(%arg0: i32) -> (i32, i32) {
    %c0_i32 = arith.constant 0 : i32
    %c0_i32_0 = arith.constant 0 : i32
    %c0_i32_1 = arith.constant 0 : i32
    return %c0_i32, %c0_i32_0 : i32, i32
  }
  func.func @transform_2(%arg0: i32) -> (i32, i32) {
    %c0_i32 = arith.constant 0 : i32
    %c0_i32_0 = arith.constant 0 : i32
    %c0_i32_1 = arith.constant 0 : i32
    return %c0_i32, %c0_i32_0 : i32, i32
  }
  func.func @transform_3(%arg0: i32) -> (i32, i32) {
    %c0_i32 = arith.constant 0 : i32
    %c0_i32_0 = arith.constant 0 : i32
    %c0_i32_1 = arith.constant 0 : i32
    return %c0_i32, %c0_i32_0 : i32, i32
  }
  func.func @transform_4(%arg0: i32) -> (i32, i32) {
    %c0_i32 = arith.constant 0 : i32
    %c0_i32_0 = arith.constant 0 : i32
    %c0_i32_1 = arith.constant 0 : i32
    return %c0_i32, %c0_i32_0 : i32, i32
  }
  func.func @transform_5(%arg0: i32) -> (i32, i32) {
    %c0_i32 = arith.constant 0 : i32
    %c0_i32_0 = arith.constant 0 : i32
    %c0_i32_1 = arith.constant 0 : i32
    return %c0_i32, %c0_i32_0 : i32, i32
  }
  func.func @transform_6(%arg0: i32) -> (i32, i32) {
    %c0_i32 = arith.constant 0 : i32
    %c0_i32_0 = arith.constant 0 : i32
    %c0_i32_1 = arith.constant 0 : i32
    return %c0_i32, %c0_i32_0 : i32, i32
  }
  func.func @transform_7(%arg0: i32) -> (i32, i32) {
    %c0_i32 = arith.constant 0 : i32
    %c0_i32_0 = arith.constant 0 : i32
    %c0_i32_1 = arith.constant 0 : i32
    return %c0_i32, %c0_i32_0 : i32, i32
  }
  func.func @transform_8(%arg0: i32) -> (i32, i32) {
    %c0_i32 = arith.constant 0 : i32
    %c0_i32_0 = arith.constant 0 : i32
    %c0_i32_1 = arith.constant 0 : i32
    return %c0_i32, %c0_i32_0 : i32, i32
  }
  func.func @transform_9(%arg0: i32) -> (i32, i32) {
    %c0_i32 = arith.constant 0 : i32
    %c0_i32_0 = arith.constant 0 : i32
    %c0_i32_1 = arith.constant 0 : i32
    return %c0_i32, %c0_i32_0 : i32, i32
  }
  func.func @transform_10(%arg0: i32) -> (i32, i32) {
    %c0_i32 = arith.constant 0 : i32
    %c0_i32_0 = arith.constant 0 : i32
    %c0_i32_1 = arith.constant 0 : i32
    return %c0_i32, %c0_i32_0 : i32, i32
  }
}

</mosaic_0001>

<bundles_post_ra>
// kernel: tpu_custom_call.1
= control target key start
LH: loop header
LB: loop body
LE: loop exit
PB: predicated region body
PF: predicated region fallthrough
CT: control target
= control target key end

     0   :  { %s1413_s0 = inlined_call_operand.hbm [shape: f32[8,2,128], index: 0, kind: input, shape index: {}]   ;;  %s1414_s1 = inlined_call_operand.hbm [shape: f32[128,128], index: 1, kind: input, shape index: {}]   ;;  %s1415_s2 = inlined_call_operand.hbm [shape: f32[256,128], index: 2, kind: input, shape index: {}]   ;;  %s1416_s3 = inlined_call_operand.vmem [shape: f32[1,128], index: 3, kind: input, shape index: {}]   ;;  %s1417_s4 = inlined_call_operand.vmem [shape: f32[2,6], index: 4, kind: input, shape index: {}]   ;;  %s1418_s5 = inlined_call_operand.hbm [shape: f32[6,128], index: 5, kind: input, shape index: {}]   ;;  %s1419_s6 = inlined_call_operand.vmem [shape: f32[1,128], index: 6, kind: input, shape index: {}]   ;;  %s1420_s7 = inlined_call_operand.hbm [shape: f32[128,128], index: 7, kind: input, shape index: {}]   ;;  %s1421_s8 = inlined_call_operand.hbm [shape: f32[128,128], index: 8, kind: input, shape index: {}]   ;;  %s1422_s9 = inlined_call_operand.vmem [shape: f32[1,128], index: 9, kind: input, shape index: {}]   ;;  %s1423_s10 = inlined_call_operand.hbm [shape: f32[2,128], index: 10, kind: output, shape index: {}]  }
   0x1   :  { %1424 = sst [smem:[#allocation20_spill]] %s1414_s1 }
   0x2   :  { %15 = vsyncpa [#allocation4], 0 }
   0x3   :  { %17 = vsyncpa [#allocation4 + $0x1], 0 }
   0x4   :  { %18 = vsyncpa [#allocation7], 0 }
   0x5   :  { %19 = vsyncpa [#allocation10], 0 }
   0x6   :  { %20 = vsyncpa [#allocation13], 0 }
   0x7   :  { %21 = vsyncpa [#allocation5], 0  ;;  %s1253_s13 = smov 0   ;;  %s1255_s14 = smov 0  }
   0x8   :  { %s1257_s15 = smov 0   ;;  %s1259_s16 = smov 0  }
   0x9 LB: > { %s1425_s1 = sld [smem:[#allocation20_spill]]  ;;  %s1277_s20 = sadd.s32 4294967295, %s1187_s16   ;;  %s1187_s16 = sphi %s1259_s16, %s1433_s16   ;;  %s1183_s15 = sphi %s1257_s15, %s1432_s15   ;;  %s1179_s14 = sphi %s1255_s14, %s1431_s14   ;;  %s1175_s13 = sphi %s1253_s13, %s1430_s13  }
   0xa   : > { %p798_p0 = scmp.ge.s32.totalorder %s1187_s16, 1  ;;  %p48_p1 = scmp.eq.s32.totalorder %s1277_s20, 0 }
   0xb   : > { %p268_p2 = scmp.lt.s32.totalorder %s1187_s16, 9  ;;  %p799_p3 = scmp.ne.s32.totalorder %s1277_s20, 0 }
   0xc   : > { %s1189_s22 = smov [#allocation6]   ;;  %s314_s26 = sshll.u32 %s1418_s5, 4  ;;  %s315_s26 = int_to_ptr.hbm [resolvable:$true] %s314_s26 }
   0xd   : > { %p1283_p4 = pnand %p798_p0, %p268_p2  ;;  %s281_s23 = sshll.u32 %s1189_s22, 4  ;;  %s282_s23 = int_to_ptr.vmem [resolvable:$true] %s281_s23 }
   0xe   : > { %s293_s30 = sshll.u32 %s1415_s2, 4  ;;  %s1190_s11 = smov [#allocation9]   ;;  %s294_s30 = int_to_ptr.hbm [resolvable:$true] %s293_s30 }
   0xf   : > { %s279_s19 = sshll.u32 %s1425_s1, 4  ;;  %p848_p5 = pneg %p1283_p4  ;;  %s280_s19 = int_to_ptr.hbm [resolvable:$true] %s279_s19 }
  0x10   : > { %s316_s12 = sshll.u32 %s1190_s11, 4  ;;  %s1191_s17 = smov 128   ;;  %s317_s12 = int_to_ptr.vmem [resolvable:$true] %s316_s12 }
  0x11   : > { %p1294_p6 = pnand %p848_p5, %p48_p1  ;;  %s1192_s18 = smov 8  }
  0x12   : > { %s328_s25 = sshll.u32 %s1420_s7, 4  ;;  %s1193_s1 = smov [#allocation8]   ;;  %s329_s25 = int_to_ptr.hbm [resolvable:$true] %s328_s25 }
  0x13   : > { %851 = dma.hbm_to_vmem [thread:$0]  (!%p1294_p6), %s280_s19, 2048, %s282_s23, [#allocation7], %s1191_s17, %s1191_s17, %s1192_s18  }
  0x14   : > { %857 = dma.hbm_to_vmem [thread:$0]  (!%p1294_p6), %s315_s26, 128, %s317_s12, [#allocation10]  }
  0x15   : > { %s295_s28 = sshll.u32 %s1193_s1, 4  ;;  %s1194_s19 = smov [#allocation11]   ;;  %s296_s28 = int_to_ptr.vmem [resolvable:$true] %s295_s28 }
  0x16   : > { %854 = dma.hbm_to_vmem [thread:$0]  (!%p1294_p6), %s294_s30, 4096, %s296_s28, [#allocation7], %s1191_s17, %s1191_s17, %s1192_s18  }
  0x17   : > { %s330_s23 = sshll.u32 %s1194_s19, 4  ;;  %s342_s11 = sshll.u32 %s1421_s8, 4  ;;  %s331_s23 = int_to_ptr.vmem [resolvable:$true] %s330_s23  ;;  %s343_s11 = int_to_ptr.hbm [resolvable:$true] %s342_s11 }
  0x18   : > { %860 = dma.hbm_to_vmem [thread:$0]  (!%p1294_p6), %s329_s25, 2048, %s331_s23, [#allocation10], %s1191_s17, %s1191_s17, %s1192_s18  }
  0x19   : > { %s1195_s1 = smov [#allocation12]   ;;  %s1318_s30 = sadd.s32 1, %s1187_s16  }
  0x1a   : > { %s344_s12 = sshll.u32 %s1195_s1, 4  ;;  %s31_s22 = ssub.s32 %s1187_s16, %s1318_s30  ;;  %s345_s12 = int_to_ptr.vmem [resolvable:$true] %s344_s12 }
  0x1b   : > { %863 = dma.hbm_to_vmem [thread:$0]  (!%p1294_p6), %s343_s11, 2048, %s345_s12, [#allocation13], %s1191_s17, %s1191_s17, %s1192_s18  }
  0x1c   : > { %s34_s24 = sadd.s32 1, %s1183_s15  ;;  %p32_p7 = scmp.eq.s32.totalorder %s31_s22, 0 }
  0x1d   : > { %p41_p8 = scmp.ne.s32.totalorder %s1183_s15, %s1179_s14  ;;  %p42_p9 = scmp.eq.s32.totalorder %s1187_s16, 0 }
  0x1e   : > { %p47_p10 = scmp.ne.s32.totalorder %s1179_s14, %s1175_s13  ;;  %p873_p13 = scmp.lt.s32.totalorder %s1187_s16, 8 }
  0x1f   : > { %s1329_s28 = scalar_select %p32_p7, %s1183_s15, %s34_s24  }
  0x20   : > { %p43_p11 = por %p42_p9, %p41_p8  ;;  %p1333_p12 = por %p48_p1, %p47_p10 }
  0x21   : > { %s361_s27 = sand.u32 1, %s1183_s15   ;;  %s806_s18 = sshll.u32 %s1187_s16, 1 }
  0x22   : > { %s805_s17 = sshll.u32 %s361_s27, 1  ;;  %s369_s26 = scalar_lea.hbm %s1413_s0, %s806_s18 }
  0x23   : > { %s365_s29 = scalar_lea.vmem [#allocation3], %s805_s17  ;;  %s371_s1 = sshll.u32 %s369_s26, 4  ;;  %s372_s1 = int_to_ptr.hbm [resolvable:$true] %s371_s1 }
  0x24   : > { %s373_s11 = sshll.u32 %s365_s29, 4  ;;  %p1343_p0 = pnand %p873_p13, %p43_p11  ;;  %s374_s11 = int_to_ptr.vmem [resolvable:$true] %s373_s11 }
  0x25   : > { %s362_s12 = scalar_lea.sflag [#allocation4], %s361_s27  ;;  %s1079_s22 = sshra.s32 %s372_s1, 4  ;;  %s1080_s22 = int_to_ptr.hbm [resolvable:$true] %s1079_s22 }
  0x26   : > { %s1081_s24 = scalar_lea.hbm %s1080_s22, 2  ;;  %p1083_p5 = pneg %p1343_p0 }
  0x27   : > { %p1082_p2 = scmp.ne.s32.totalorder %s1080_s22, %s1081_s24  ;;  %s1086_s18 = scalar_lea.hbm %s1413_s0, 16 }
  0x28   : > { %p1087_p8 = scmp.lt.s32.totalorder %s1080_s22, %s1413_s0  ;;  %p1088_p9 = scmp.lt.s32.totalorder %s1086_s18, %s1081_s24 }
  0x29   : > { %p1084_p6 = pnand %p1083_p5, %p1082_p2 }
  0x2a   : > { %p1089_p10 = por %p1088_p9, %p1087_p8 }
  0x2b   : > { %p1085_p7 = pneg %p1084_p6 }
  0x2d   : > { %p1090_p11 = pnand %p1089_p10, %p1085_p7 }
  0x2f   : > { %1093 = shalt.err (!%p1090_p11)
}
  0x30   : > { %867 = dma.hbm_to_vmem [thread:$0]  (!%p1343_p0), %s372_s1, 32, %s374_s11, %s362_s12  }
  0x31   : > { %382 = sbr.rel (%p1283_p4) target bundleno = 644 (0x284), region = 60  ;;  %s384_s27 = sand.u32 (!%p1283_p4), 1, %s1179_s14  }
  0x32   : > { %s1360_s26 = sshll.u32 (!%p1283_p4), %s384_s27, 1  ;;  %s385_s29 = scalar_lea.sflag (!%p1283_p4), [#allocation4], %s384_s27 }
  0x33   : > { %s388_s16 = scalar_lea.vmem (!%p1283_p4), [#allocation3], %s1360_s26 }
  0x36   : > { %1154 = dma.done.wait (%p1333_p12), %s385_s29, 32  }
  0x37   : > { %1156 = vsyncadd (%p1333_p12), %s385_s29, 4294967264 }
  0x38   : > { %1158 = dma.done.wait (%p48_p1), [#allocation7], 6144  }
  0x39   : > { %1160 = vsyncadd (%p48_p1), [#allocation7], 4294961152 }
  0x3a   : > { %1162 = dma.done.wait (%p48_p1), [#allocation10], 2176  }
  0x3b   : > { %1164 = vsyncadd (%p48_p1), [#allocation10], 4294965120 }
  0x3c   : > { %1166 = dma.done.wait (%p48_p1), [#allocation13], 2048  }
  0x3d   : > { %1168 = vsyncadd (%p48_p1), [#allocation13], 4294965248  ;;  %449 = sbr.rel (%p799_p3) target bundleno = 69 (0x45), region = 88 }
  0x42   : > { %v1196_v0 = vmov 0.0  }
  0x43   : > { %450 = vst [vmem:[#allocation2] sm:$0x3] %v1196_v0 }
  0x44   : > { %451 = vst [vmem:[#allocation2 + $0x2] sm:$0x3] %v1196_v0 }
  0x45 PF: > { %v469_v1 = vld [vmem:[#allocation6 + $0x78] sm:$0xff]  ;;  %v468_v2 = vld [vmem:[#allocation6 + $0x70] sm:$0xff]  ;;  %v467_v3 = vld [vmem:[#allocation6 + $0x68] sm:$0xff]  ;;  %p815_p1 = scmp.ne.s32.totalorder %s1277_s20, 7 }
  0x46   : > { %470 = vmatpush.msra.mxu0 %v469_v1  ;;  %v466_v4 = vld [vmem:[#allocation6 + $0x60] sm:$0xff]  ;;  %v526_v5 = vld [vmem:[#allocation8 + $0xf8] sm:$0xff]  ;;  %v525_v7 = vld [vmem:[#allocation8 + $0xf0] sm:$0xff] }
  0x47   : > { %v465_v6 = vld [vmem:[#allocation6 + $0x58] sm:$0xff]  ;;  %551 = vmatpush.msra.mxu2 %v526_v5  ;;  %v524_v9 = vld [vmem:[#allocation8 + $0xe8] sm:$0xff]  ;;  %v509_v10 = vld [vmem:[#allocation8 + $0x70] sm:$0xff] }
  0x48   : > { %471 = vmatpush.msra.mxu0 %v468_v2  ;;  %v510_v8 = vld [vmem:[#allocation8 + $0x78] sm:$0xff]  ;;  %v464_v11 = vld [vmem:[#allocation6 + $0x50] sm:$0xff]  ;;  %v508_v12 = vld [vmem:[#allocation8 + $0x68] sm:$0xff] }
  0x49   : > { %531 = vmatpush.msra.mxu1 %v510_v8  ;;  %552 = vmatpush.msra.mxu2 %v525_v7  ;;  %v523_v13 = vld [vmem:[#allocation8 + $0xe0] sm:$0xff]  ;;  %v463_v14 = vld [vmem:[#allocation6 + $0x48] sm:$0xff]  ;;  %v522_v16 = vld [vmem:[#allocation8 + $0xd8] sm:$0xff] }
  0x4a   : > { %472 = vmatpush.msra.mxu0 %v467_v3  ;;  %v507_v15 = vld [vmem:[#allocation8 + $0x60] sm:$0xff]  ;;  %v506_v18 = vld [vmem:[#allocation8 + $0x58] sm:$0xff]  ;;  %v521_v19 = vld [vmem:[#allocation8 + $0xd0] sm:$0xff] }
  0x4b   : > { %532 = vmatpush.msra.mxu1 %v509_v10  ;;  %553 = vmatpush.msra.mxu2 %v524_v9  ;;  %v462_v17 = vld [vmem:[#allocation6 + $0x40] sm:$0xff]  ;;  %v461_v20 = vld [vmem:[#allocation6 + $0x38] sm:$0xff]  ;;  %v505_v21 = vld [vmem:[#allocation8 + $0x50] sm:$0xff] }
  0x4c   : > { %473 = vmatpush.msra.mxu0 %v466_v4  ;;  %v520_v22 = vld [vmem:[#allocation8 + $0xc8] sm:$0xff]  ;;  %v460_v23 = vld [vmem:[#allocation6 + $0x30] sm:$0xff]  ;;  %v519_v25 = vld [vmem:[#allocation8 + $0xc0] sm:$0xff] }
  0x4d   : > { %533 = vmatpush.msra.mxu1 %v508_v12  ;;  %554 = vmatpush.msra.mxu2 %v523_v13  ;;  %v504_v24 = vld [vmem:[#allocation8 + $0x48] sm:$0xff]  ;;  %v503_v27 = vld [vmem:[#allocation8 + $0x40] sm:$0xff]  ;;  %v518_v28 = vld [vmem:[#allocation8 + $0xb8] sm:$0xff] }
  0x4e   : > { %474 = vmatpush.msra.mxu0 %v465_v6  ;;  %v459_v26 = vld [vmem:[#allocation6 + $0x28] sm:$0xff]  ;;  %v458_v29 = vld [vmem:[#allocation6 + $0x20] sm:$0xff]  ;;  %v502_v30 = vld [vmem:[#allocation8 + $0x38] sm:$0xff] }
  0x4f   : > { %534 = vmatpush.msra.mxu1 %v507_v15  ;;  %555 = vmatpush.msra.mxu2 %v522_v16  ;;  %v517_v31 = vld [vmem:[#allocation8 + $0xb0] sm:$0xff]  ;;  %v457_v32 = vld [vmem:[#allocation6 + $0x18] sm:$0xff]  ;;  %v516_v34 = vld [vmem:[#allocation8 + $0xa8] sm:$0xff] }
  0x50   : > { %475 = vmatpush.msra.mxu0 %v464_v11  ;;  %v501_v33 = vld [vmem:[#allocation8 + $0x30] sm:$0xff]  ;;  %v500_v36 = vld [vmem:[#allocation8 + $0x28] sm:$0xff]  ;;  %v515_v37 = vld [vmem:[#allocation8 + $0xa0] sm:$0xff] }
  0x51   : > { %535 = vmatpush.msra.mxu1 %v506_v18  ;;  %556 = vmatpush.msra.mxu2 %v521_v19  ;;  %v456_v35 = vld [vmem:[#allocation6 + $0x10] sm:$0xff]  ;;  %v455_v38 = vld [vmem:[#allocation6 + $0x8] sm:$0xff]  ;;  %v514_v39 = vld [vmem:[#allocation8 + $0x98] sm:$0xff] }
  0x52   : > { %476 = vmatpush.msra.mxu0 %v463_v14  ;;  %v454_v40 = vld [vmem:[#allocation6] sm:$0xff]  ;;  %v453_v41 = vld [vmem:[#allocation2] sm:$0x3]  ;;  %v513_v43 = vld [vmem:[#allocation8 + $0x90] sm:$0xff] }
  0x53   : > { %536 = vmatpush.msra.mxu1 %v505_v21  ;;  %557 = vmatpush.msra.mxu2 %v520_v22  ;;  %v499_v42 = vld [vmem:[#allocation8 + $0x20] sm:$0xff]  ;;  %v498_v44 = vld [vmem:[#allocation8 + $0x18] sm:$0xff]  ;;  %v512_v45 = vld [vmem:[#allocation8 + $0x88] sm:$0xff] }
  0x54   : > { %477 = vmatpush.msra.mxu0 %v462_v17  ;;  %v497_v46 = vld [vmem:[#allocation8 + $0x10] sm:$0xff]  ;;  %v511_v47 = vld [vmem:[#allocation8 + $0x80] sm:$0xff]  ;;  %v494_v48 = vld [vmem:[#allocation2 + $0x2] sm:$0x3] }
  0x55   : > { %537 = vmatpush.msra.mxu1 %v504_v24  ;;  %558 = vmatpush.msra.mxu2 %v519_v25  ;;  %v496_v49 = vld [vmem:[#allocation8 + $0x8] sm:$0xff]  ;;  %v495_v50 = vld [vmem:[#allocation8] sm:$0xff]  ;;  %v452_v51 = vld [vmem:[%s388_s16] sm:$0x3] }
  0x56   : > { %478 = vmatpush.msra.mxu0 %v461_v20  ;;  %v922_v55 = vld [vmem:[%s1416_s3] ss:$0 sm:$0xff] }
  0x57   : > { %538 = vmatpush.msra.mxu1 %v503_v27  ;;  %559 = vmatpush.msra.mxu2 %v518_v28 }
  0x58   : > { %479 = vmatpush.msra.mxu0 %v460_v23 }
  0x59   : > { %539 = vmatpush.msra.mxu1 %v502_v30  ;;  %560 = vmatpush.msra.mxu2 %v517_v31 }
  0x5a   : > { %480 = vmatpush.msra.mxu0 %v459_v26 }
  0x5b   : > { %540 = vmatpush.msra.mxu1 %v501_v33  ;;  %561 = vmatpush.msra.mxu2 %v516_v34 }
  0x5c   : > { %481 = vmatpush.msra.mxu0 %v458_v29 }
  0x5d   : > { %541 = vmatpush.msra.mxu1 %v500_v36  ;;  %562 = vmatpush.msra.mxu2 %v515_v37 }
  0x5e   : > { %482 = vmatpush.msra.mxu0 %v457_v32 }
  0x5f   : > { %563 = vmatpush.msra.mxu2 %v514_v39  ;;  %542 = vmatpush.msra.mxu1 %v499_v42 }
  0x60   : > { %483 = vmatpush.msra.mxu0 %v456_v35 }
  0x61   : > { %564 = vmatpush.msra.mxu2 %v513_v43  ;;  %543 = vmatpush.msra.mxu1 %v498_v44 }
  0x62   : > { %484 = vmatpush.msra.mxu0 %v455_v38 }
  0x63   : > { %565 = vmatpush.msra.mxu2 %v512_v45  ;;  %544 = vmatpush.msra.mxu1 %v497_v46 }
  0x64   : > { %485 = vmatpush.msra.mxu0 %v454_v40 }
  0x65   : > { %486 = vmatmul.f32.vlgmr.msra.gmra.mxu0 %v453_v41  ;;  %566 = vmatpush.msra.mxu2 %v511_v47 }
  0x66   : > { %567 = vmatmul.f32.vlgmr.msra.gmra.mxu2 %v494_v48  ;;  %545 = vmatpush.msra.mxu1 %v496_v49 }
  0x68   : > { %546 = vmatpush.msra.mxu1 %v495_v50 }
  0xe2   : > { %v487_v52 = vpop.f32.mrf.mxu0 }
  0xe3   : > { %v490_v53 = vadd.f32 %v487_v52, %v452_v51 }
  0xe5   : > { %923 = vtanh.f32 %v490_v53 }
  0xe9   : > { %v568_v57 = vpop.f32.mrf.mxu2 }
  0xeb   : > { %v924_v54 = vpop.eup %923 }
  0xec   : > { %492 = vst [vmem:[#allocation2] sm:$0x3] %v924_v54  ;;  %547 = vmatmul.f32.vlgmr.msra.gmra.mxu1 %v924_v54 }
 0x169   : > { %v548_v56 = vpop.f32.mrf.mxu1 }
 0x16a   : > { %v549_v58 = vadd.f32 %v922_v55, %v548_v56 }
 0x16c   : > { %v569_v59 = vadd.f32 %v568_v57, %v549_v58 }
 0x16e   : > { %925 = vtanh.f32 %v569_v59 }
 0x171   : > { %576 = sbr.rel (%p815_p1) target bundleno = 639 (0x27f), region = 92 }
 0x174   : > { %v926_v60 = vpop.eup %925 }
 0x175   : > { %572 = vst [vmem:[#allocation2 + $0x2] sm:$0x3] %v926_v60 }
 0x176   : > { %v619_v61 = vld [vmem:[#allocation9] sm:$0x3f]  ;;  %vm628_vm0 = vcmask 1045504   ;;  %v618_v62 = vld [vmem:[%s1417_s4] sm:$0x3]  ;;  %vm624_vm1 = vcmask 48128  }
 0x177   : > { %816 = vmatpush.msk.msra.mxu1 %vm628_vm0, %v619_v61  ;;  %v667_v63 = vld [vmem:[#allocation11 + $0x78] sm:$0xff]  ;;  %v666_v0 = vld [vmem:[#allocation11 + $0x70] sm:$0xff]  ;;  %v665_v3 = vld [vmem:[#allocation11 + $0x68] sm:$0xff] }
 0x178   : > { %v593_v1 = vld [vmem:[#allocation12 + $0x78] sm:$0xff]  ;;  %817 = vmatmul.msk.f32.vlgmr.msra.gmra.mxu1 %vm624_vm1, %v618_v62  ;;  %668 = vmatpush.msra.mxu2 %v667_v63  ;;  %v592_v2 = vld [vmem:[#allocation12 + $0x70] sm:$0xff]  ;;  %v591_v4 = vld [vmem:[#allocation12 + $0x68] sm:$0xff] }
 0x179   : > { %598 = vmatpush.msra.mxu0 %v593_v1  ;;  %v664_v5 = vld [vmem:[#allocation11 + $0x60] sm:$0xff]  ;;  %v663_v7 = vld [vmem:[#allocation11 + $0x58] sm:$0xff]  ;;  %v662_v9 = vld [vmem:[#allocation11 + $0x50] sm:$0xff] }
 0x17a   : > { %669 = vmatpush.msra.mxu2 %v666_v0  ;;  %v590_v6 = vld [vmem:[#allocation12 + $0x60] sm:$0xff]  ;;  %v589_v8 = vld [vmem:[#allocation12 + $0x58] sm:$0xff]  ;;  %v588_v10 = vld [vmem:[#allocation12 + $0x50] sm:$0xff] }
 0x17b   : > { %599 = vmatpush.msra.mxu0 %v592_v2  ;;  %v661_v11 = vld [vmem:[#allocation11 + $0x48] sm:$0xff]  ;;  %v660_v13 = vld [vmem:[#allocation11 + $0x40] sm:$0xff]  ;;  %v659_v15 = vld [vmem:[#allocation11 + $0x38] sm:$0xff] }
 0x17c   : > { %670 = vmatpush.msra.mxu2 %v665_v3  ;;  %v587_v12 = vld [vmem:[#allocation12 + $0x48] sm:$0xff]  ;;  %v586_v14 = vld [vmem:[#allocation12 + $0x40] sm:$0xff]  ;;  %v585_v16 = vld [vmem:[#allocation12 + $0x38] sm:$0xff] }
 0x17d   : > { %600 = vmatpush.msra.mxu0 %v591_v4  ;;  %v658_v17 = vld [vmem:[#allocation11 + $0x30] sm:$0xff]  ;;  %v657_v19 = vld [vmem:[#allocation11 + $0x28] sm:$0xff]  ;;  %v656_v21 = vld [vmem:[#allocation11 + $0x20] sm:$0xff] }
 0x17e   : > { %671 = vmatpush.msra.mxu2 %v664_v5  ;;  %v584_v18 = vld [vmem:[#allocation12 + $0x30] sm:$0xff]  ;;  %v583_v20 = vld [vmem:[#allocation12 + $0x28] sm:$0xff]  ;;  %v582_v22 = vld [vmem:[#allocation12 + $0x20] sm:$0xff] }
 0x17f   : > { %601 = vmatpush.msra.mxu0 %v590_v6  ;;  %v655_v23 = vld [vmem:[#allocation11 + $0x18] sm:$0xff]  ;;  %v654_v25 = vld [vmem:[#allocation11 + $0x10] sm:$0xff]  ;;  %v653_v26 = vld [vmem:[#allocation11 + $0x8] sm:$0xff] }
 0x180   : > { %672 = vmatpush.msra.mxu2 %v663_v7  ;;  %v581_v24 = vld [vmem:[#allocation12 + $0x18] sm:$0xff]  ;;  %v580_v27 = vld [vmem:[#allocation12 + $0x10] sm:$0xff]  ;;  %v652_v28 = vld [vmem:[#allocation11] sm:$0xff] }
 0x181   : > { %602 = vmatpush.msra.mxu0 %v589_v8  ;;  %v579_v29 = vld [vmem:[#allocation12 + $0x8] sm:$0xff]  ;;  %v578_v30 = vld [vmem:[#allocation12] sm:$0xff]  ;;  %v577_v31 = vld [vmem:[#allocation2 + $0x2] sm:$0x3] }
 0x182   : > { %673 = vmatpush.msra.mxu2 %v662_v9  ;;  %v927_v32 = vld [vmem:[%s1419_s6] ss:$0 sm:$0xff] }
 0x183   : > { %603 = vmatpush.msra.mxu0 %v588_v10  ;;  %v928_v35 = vld [vmem:[%s1422_s9] ss:$0 sm:$0xff] }
 0x184   : > { %674 = vmatpush.msra.mxu2 %v661_v11 }
 0x185   : > { %604 = vmatpush.msra.mxu0 %v587_v12 }
 0x186   : > { %675 = vmatpush.msra.mxu2 %v660_v13 }
 0x187   : > { %605 = vmatpush.msra.mxu0 %v586_v14 }
 0x188   : > { %676 = vmatpush.msra.mxu2 %v659_v15 }
 0x189   : > { %606 = vmatpush.msra.mxu0 %v585_v16 }
 0x18a   : > { %677 = vmatpush.msra.mxu2 %v658_v17 }
 0x18b   : > { %607 = vmatpush.msra.mxu0 %v584_v18 }
 0x18c   : > { %678 = vmatpush.msra.mxu2 %v657_v19 }
 0x18d   : > { %608 = vmatpush.msra.mxu0 %v583_v20 }
 0x18e   : > { %679 = vmatpush.msra.mxu2 %v656_v21 }
 0x18f   : > { %609 = vmatpush.msra.mxu0 %v582_v22 }
 0x190   : > { %680 = vmatpush.msra.mxu2 %v655_v23 }
 0x191   : > { %610 = vmatpush.msra.mxu0 %v581_v24 }
 0x192   : > { %681 = vmatpush.msra.mxu2 %v654_v25 }
 0x193   : > { %611 = vmatpush.msra.mxu0 %v580_v27 }
 0x194   : > { %682 = vmatpush.msra.mxu2 %v653_v26 }
 0x195   : > { %612 = vmatpush.msra.mxu0 %v579_v29 }
 0x196   : > { %683 = vmatpush.msra.mxu2 %v652_v28 }
 0x197   : > { %613 = vmatpush.msra.mxu0 %v578_v30 }
 0x198   : > { %614 = vmatmul.f32.vlgmr.msra.gmra.mxu0 %v577_v31 }
 0x1f5   : > { %v649_v33 = vpop.f32.mrf.mxu1 }
 0x1f6   : > { %v650_v34 = vadd.f32 %v927_v32, %v649_v33 }
 0x1f8   : > { %684 = vmatmul.f32.vlgmr.msra.gmra.mxu2 %v650_v34 }
 0x215   : > { %v615_v36 = vpop.f32.mrf.mxu0 }
 0x216   : > { %v616_v37 = vadd.f32 %v928_v35, %v615_v36 }
 0x27b   : > { %v685_v38 = vpop.f32.mrf.mxu2 }
 0x27c   : > { %v688_v39 = vadd.f32 %v685_v38, %v616_v37 }
 0x27e   : > { %689 = vst [vmem:[#allocation14] sm:$0x3] %v688_v39 }
 0x27f PF: > { %p879_p3 = scmp.eq.s32.totalorder %s1277_s20, 7  ;;  %s1197_s17 = smov [#allocation14]  }
 0x280   : > { %s696_s18 = sshll.u32 %s1197_s17, 4  ;;  %s698_s27 = sshll.u32 %s1423_s10, 4  ;;  %s697_s18 = int_to_ptr.vmem [resolvable:$true] %s696_s18  ;;  %s699_s27 = int_to_ptr.hbm [resolvable:$true] %s698_s27 }
 0x281   : > { %845 = dma.vmem_to_hbm [thread:$0]  (%p879_p3), %s697_s18, 32, %s699_s27, [#allocation5]  }
 0x282   : > { %1170 = dma.done.wait (%p879_p3), [#allocation5], 32  }
 0x283   : > { %1172 = vsyncadd (%p879_p3), [#allocation5], 4294967264 }
 0x284 PF: > { %p24_p4 = scmp.ge.s32.totalorder %s1318_s30, 10   ;;  %s1430_s13 = smov %s1179_s14 }
 0x285   : > { %s1431_s14 = smov %s1183_s15  ;;  %s1432_s15 = smov %s1329_s28 }
 0x286   : > { %s1433_s16 = smov %s1318_s30  ;;  %26 = sbr.rel (!%p24_p4) target bundleno = 9 (0x9), region = 126 }
 0x28b   :  { %712 = vsyncpa [#allocation4], 1 }
 0x28c   :  { %714 = vsyncpa [#allocation4 + $0x1], 1 }
 0x28d   :  { %715 = vsyncpa [#allocation7], 1 }
 0x28e   :  { %716 = vsyncpa [#allocation10], 1 }
 0x28f   :  { %717 = vsyncpa [#allocation13], 1 }
 0x290   :  { %718 = vsyncpa [#allocation5], 1 }
 0x291   :  { %720 = vsyncpa [#allocation5 + $0x1], 1 }

</bundles_post_ra>
